<compile_context>
chip_gen: v7x
topology: tpu7x:2x2x1
jax: 0.10.0
libtpu: 0.0.40
codegen_flags: <defaults>
</compile_context>

<pallas_src>
import functools
import math

import jax
import jax.numpy as jnp
from jax.experimental import pallas as pl
from jax.experimental.pallas import tpu as pltpu


def data_embedding_kernel(xc_ref, w_ref, pe_ref, o_ref):
    # xc_ref: (bt, L, 3C)  pre-built circular taps [x[t-1] | x[t] | x[t+1]]
    # w_ref : (3C, D)      flattened conv weight, row index = tap*C + c
    # pe_ref: (L, D)       positional embedding
    # o_ref : (bt, L, D)
    bt, L, threeC = xc_ref.shape
    D = o_ref.shape[-1]

    # One tall MXU matmul per grid step (f32 accumulate, f32 inputs).
    xc = xc_ref[...].reshape(bt * L, threeC)
    y = jnp.dot(xc, w_ref[...], preferred_element_type=jnp.float32)

    # Positional embedding broadcast over the batch tile, added in f32.
    y = y.reshape(bt, L, D) + pe_ref[...].astype(jnp.float32)[None]

    # Dropout(p=0.1): inference mode -> identity.
    # TODO(synk): training-mode dropout would need pltpu.prng_seed/prng_random_bits.
    o_ref[...] = y.astype(o_ref.dtype)


def _vmem_capacity_bytes():
    """Physical VMEM of the local TPU generation (64 MiB v7x, 128 MiB v5e/v6e)."""
    try:
        cap = getattr(pltpu.get_tpu_info(), "vmem_capacity_bytes", None)
        if cap:
            return int(cap)
    except Exception:
        pass
    return 64 * 1024 * 1024  # conservative (v7x-sized) fallback


def _choose_bt(B, L, C, D, in_itemsize, out_itemsize, budget_bytes):
    """Largest batch tile that (a) fits the VMEM budget including in-kernel f32
    temporaries, (b) leaves >= 2 grid steps whenever B >= 2 (v7x TensorCore
    sharding), and (c) leaves >= 4 steps once the per-step output block is
    already ~2 MiB (pipelining: prefetch i+1 / writeback i-1 overlap compute)."""
    fixed = 2 * (3 * C * D + L * D) * 4                 # weight + pe blocks, double-buffered f32

    def vmem_needed(bt):
        io = 2 * bt * L * (3 * C * in_itemsize + D * out_itemsize)  # x_cat/out blocks, double-buffered
        tmp = bt * L * (3 * C + 2 * D) * 4                          # in-kernel f32 matmul/add temporaries
        return fixed + io + tmp

    min_steps = 2 if B >= 2 else 1
    best = 1
    for d in (d for d in range(1, B + 1) if B % d == 0):
        steps = B // d
        if vmem_needed(d) > budget_bytes or steps < min_steps:
            continue
        if d * L * D * out_itemsize >= (2 << 20) and steps < min(4, B):
            continue  # block already big enough; keep >= 2x num_cores steps
        best = max(best, d)
    return best


@functools.partial(jax.jit, static_argnames=("out_dtype",))
def data_embedding(x, conv_w, pe, out_dtype=None):
    """x: (B, L, C); conv_w: (3, C, D) with conv_w[k, c, d] == W_pt[d, c, k];
    pe: (L, D). Returns (B, L, D) in out_dtype (default x.dtype; pass
    jnp.bfloat16 to halve the dominant output writeback traffic)."""
    B, L, C = x.shape
    K, C2, D = conv_w.shape
    assert K == 3 and C2 == C and pe.shape == (L, D)
    out_dtype = x.dtype if out_dtype is None else jnp.dtype(out_dtype)

    # Circular-conv taps built once under XLA, OUTSIDE the serial grid loop:
    #   y[t] = W0 @ x[(t-1) % L] + W1 @ x[t] + W2 @ x[(t+1) % L]
    # This hoists all shift/concat relayout work out of the kernel entirely.
    x_prev = jnp.roll(x, 1, axis=1)
    x_next = jnp.roll(x, -1, axis=1)
    x_cat = jnp.concatenate([x_prev, x, x_next], axis=-1)           # (B, L, 3C)
    w_flat = conv_w.reshape(3 * C, D)                               # row = tap*C + c

    in_itemsize = jnp.dtype(x.dtype).itemsize
    out_itemsize = jnp.dtype(out_dtype).itemsize
    vmem_cap = _vmem_capacity_bytes()
    bt = _choose_bt(B, L, C, D, in_itemsize, out_itemsize,
                    budget_bytes=int(vmem_cap * 0.4))
    vmem_limit = int(max(32 * 1024 * 1024, min(96 * 1024 * 1024, (vmem_cap * 3) // 4)))

    cost = pl.CostEstimate(
        flops=2 * B * L * 3 * C * D,
        transcendentals=0,
        bytes_accessed=(B * L * 3 * C * in_itemsize + B * L * D * out_itemsize
                        + 3 * C * D * 4 + L * D * 4),
    )

    # TODO(synk): for very large L (block > VMEM even at bt=1) add an L-tiling
    # grid axis with a +/-1-row circular halo; not needed at these sizes.
    # Note: L should ideally be a multiple of 8 to keep the in-kernel reshapes
    # sublane-aligned (true for the example and typical sequence lengths).
    return pl.pallas_call(
        data_embedding_kernel,
        out_shape=jax.ShapeDtypeStruct((B, L, D), out_dtype),
        grid_spec=pltpu.PrefetchScalarGridSpec(
            num_scalar_prefetch=0,
            grid=(B // bt,),
            in_specs=[
                pl.BlockSpec((bt, L, 3 * C), lambda b: (b, 0, 0)),   # batch tile of taps
                pl.BlockSpec((3 * C, D), lambda b: (0, 0)),          # full flattened weight
                pl.BlockSpec((L, D), lambda b: (0, 0)),              # full positional embedding
            ],
            out_specs=pl.BlockSpec((bt, L, D), lambda b: (b, 0, 0)),
        ),
        compiler_params=pltpu.CompilerParams(
            dimension_semantics=("parallel",),
            vmem_limit_bytes=vmem_limit,
        ),
        cost_estimate=cost,
    )(x_cat, w_flat, pe)


def make_positional_embedding(L, d_model):
    """Matches PositionalEmbedding buffer pe[:, :L] (d_model must be even)."""
    assert d_model % 2 == 0, "PositionalEmbedding assumes even d_model"
    position = jnp.arange(L, dtype=jnp.float32)[:, None]                    # (L, 1)
    div_term = jnp.exp(jnp.arange(0, d_model, 2, dtype=jnp.float32)
                       * (-(math.log(10000.0) / d_model)))                  # (D/2,)
    pe = jnp.zeros((L, d_model), dtype=jnp.float32)
    pe = pe.at[:, 0::2].set(jnp.sin(position * div_term))
    pe = pe.at[:, 1::2].set(jnp.cos(position * div_term))
    return pe


def make_conv_weight(key, c_in, d_model):
    """Conv1d(c_in, d_model, k=3, bias=False) with kaiming_normal_(fan_in,
    leaky_relu) init. Returned layout (k, c_in, d_model): w[k, c, d] == W_pt[d, c, k]."""
    fan_in = c_in * 3
    gain = math.sqrt(2.0 / (1.0 + 0.01 ** 2))        # leaky_relu, slope 0.01
    std = gain / math.sqrt(fan_in)
    w_pt = jax.random.normal(key, (d_model, c_in, 3), dtype=jnp.float32) * std
    return jnp.transpose(w_pt, (2, 1, 0))            # (3, c_in, d_model)


def data_embedding_ref(x, conv_w, pe):
    """Pure-JAX f32 reference of DataEmbedding (inference)."""
    x_prev = jnp.roll(x, 1, axis=1)
    x_next = jnp.roll(x, -1, axis=1)
    y = (jnp.einsum('blc,cd->bld', x_prev, conv_w[0])
         + jnp.einsum('blc,cd->bld', x, conv_w[1])
         + jnp.einsum('blc,cd->bld', x_next, conv_w[2]))
    return y + pe[None]


if __name__ == "__main__":
    B, L, C_IN, D_MODEL = 2, 16, 4, 128   # D=128 keeps the output lane-dense

    key = jax.random.PRNGKey(0)
    kx, kw = jax.random.split(key)

    x = jax.random.normal(kx, (B, L, C_IN), dtype=jnp.float32)
    conv_w = make_conv_weight(kw, C_IN, D_MODEL)
    pe = make_positional_embedding(L, D_MODEL)

    out = data_embedding(x, conv_w, pe)
    jax.block_until_ready(out)
    assert out.shape == (B, L, D_MODEL) and out.dtype == x.dtype

    # Correctness check vs pure-JAX f32 reference (f32 matmul inputs; tolerance
    # covers a possible default-precision bf16-pass MXU f32 matmul).
    ref = data_embedding_ref(x, conv_w, pe)
    max_err = float(jnp.max(jnp.abs(out - ref)))
    assert max_err < 2e-2, f"max abs error {max_err} too large"

    print("KERNEL_OK")
</pallas_src>

<mosaic_0001>
module attributes {stable_mosaic.version = 11 : i64} {
  func.func @data_embedding_kernel(%arg0: i32, %arg1: memref<1x16x12xf32, #tpu.memory_space<vmem>>, %arg2: memref<12x128xf32, #tpu.memory_space<vmem>>, %arg3: memref<16x128xf32, #tpu.memory_space<vmem>>, %arg4: memref<1x16x128xf32, #tpu.memory_space<vmem>>) attributes {dimension_semantics = [#tpu.dimension_semantics<parallel>], iteration_bounds = array<i64: 2>, scalar_prefetch = 0 : i64, scratch_operands = 0 : i64, tpu.core_type = #tpu.core_type<tc>, window_params = [{transform_indices = @transform_0, window_bounds = array<i64: 1, 16, 12>}, {pipeline_mode = #tpu.pipeline_mode<synchronous>, transform_indices = @transform_1, window_bounds = array<i64: 12, 128>}, {pipeline_mode = #tpu.pipeline_mode<synchronous>, transform_indices = @transform_2, window_bounds = array<i64: 16, 128>}, {transform_indices = @transform_3, window_bounds = array<i64: 1, 16, 128>}]} {
    %c0 = arith.constant 0 : index
    %c0_0 = arith.constant 0 : index
    %c0_1 = arith.constant 0 : index
    %0 = vector.load %arg1[%c0, %c0_0, %c0_1] : memref<1x16x12xf32, #tpu.memory_space<vmem>>, vector<1x16x12xf32>
    %1 = vector.shape_cast %0 : vector<1x16x12xf32> to vector<16x12xf32>
    %c0_2 = arith.constant 0 : index
    %c0_3 = arith.constant 0 : index
    %2 = vector.load %arg2[%c0_2, %c0_3] : memref<12x128xf32, #tpu.memory_space<vmem>>, vector<12x128xf32>
    %cst = arith.constant dense<0.000000e+00> : vector<16x128xf32>
    %3 = tpu.matmul %1, %2, %cst {dimension_numbers = #tpu.dot_dimension_numbers<[1], [0], [0], [1], [0, 0, 1, 1], [], []>} : vector<16x12xf32>, vector<12x128xf32>, vector<16x128xf32> -> vector<16x128xf32>
    %4 = vector.shape_cast %3 : vector<16x128xf32> to vector<1x16x128xf32>
    %c0_4 = arith.constant 0 : index
    %c0_5 = arith.constant 0 : index
    %5 = vector.load %arg3[%c0_4, %c0_5] : memref<16x128xf32, #tpu.memory_space<vmem>>, vector<16x128xf32>
    %6 = vector.shape_cast %5 : vector<16x128xf32> to vector<1x16x128xf32>
    %7 = arith.addf %4, %6 : vector<1x16x128xf32>
    %c0_6 = arith.constant 0 : index
    %c0_7 = arith.constant 0 : index
    %c0_8 = arith.constant 0 : index
    %8 = vector.load %arg4[%c0_6, %c0_7, %c0_8] : memref<1x16x128xf32, #tpu.memory_space<vmem>>, vector<1x16x128xf32>
    tpu.vector_store %arg4[%c0_6, %c0_7, %c0_8], %7 {strides = array<i32>} : memref<1x16x128xf32, #tpu.memory_space<vmem>>, vector<1x16x128xf32>,
    return
  }
  func.func @transform_0(%arg0: i32) -> (i32, i32, i32) {
    %c0_i32 = arith.constant 0 : i32
    %c0_i32_0 = arith.constant 0 : i32
    %c0_i32_1 = arith.constant 0 : i32
    return %arg0, %c0_i32, %c0_i32_0 : i32, i32, i32
  }
  func.func @transform_1(%arg0: i32) -> (i32, i32) {
    %c0_i32 = arith.constant 0 : i32
    %c0_i32_0 = arith.constant 0 : i32
    %c0_i32_1 = arith.constant 0 : i32
    return %c0_i32, %c0_i32_0 : i32, i32
  }
  func.func @transform_2(%arg0: i32) -> (i32, i32) {
    %c0_i32 = arith.constant 0 : i32
    %c0_i32_0 = arith.constant 0 : i32
    %c0_i32_1 = arith.constant 0 : i32
    return %c0_i32, %c0_i32_0 : i32, i32
  }
  func.func @transform_3(%arg0: i32) -> (i32, i32, i32) {
    %c0_i32 = arith.constant 0 : i32
    %c0_i32_0 = arith.constant 0 : i32
    %c0_i32_1 = arith.constant 0 : i32
    return %arg0, %c0_i32, %c0_i32_0 : i32, i32, i32
  }
}

</mosaic_0001>

<bundles_post_ra>
// kernel: data_embedding.1
= control target key start
LH: loop header
LB: loop body
LE: loop exit
PB: predicated region body
PF: predicated region fallthrough
CT: control target
= control target key end

     0   :  { %8 = vsyncpa [#allocation3], 0  ;;  %s620_s0 = inlined_call_operand.vmem [shape: f32[2,16,12], index: 0, kind: input, shape index: {}]   ;;  %s621_s1 = inlined_call_operand.vmem [shape: f32[12,128], index: 1, kind: input, shape index: {}]   ;;  %s622_s2 = inlined_call_operand.vmem [shape: f32[16,128], index: 2, kind: input, shape index: {}]   ;;  %s623_s3 = inlined_call_operand.hbm [shape: f32[2,16,128], index: 3, kind: output, shape index: {}]  }
   0x1   :  { %10 = vsyncpa [#allocation3 + $0x1], 0  ;;  %s505_s12 = smov 0   ;;  %s507_s13 = smov 0  }
   0x2   :  { %s509_s14 = smov 0   ;;  %s511_s15 = smov 0  }
   0x3 LB: > { %s526_s16 = sadd.s32 4294967295, %s479_s15   ;;  %s341_s17 = sadd.s32 4294967294, %s479_s15   ;;  %s479_s15 = sphi %s511_s15, %s629_s15   ;;  %s475_s14 = sphi %s509_s14, %s628_s14   ;;  %s471_s13 = sphi %s507_s13, %s627_s13   ;;  %s467_s12 = sphi %s505_s12, %s626_s12  }
   0x4   : > { %s530_s18 = sadd.s32 1, %s479_s15   ;;  %s91_s19 = sadd.s32 1, %s475_s14 }
   0x5   : > { %s88_s20 = ssub.s32 %s479_s15, %s530_s18  ;;  %p101_p0 = scmp.ne.s32.totalorder %s475_s14, %s471_s13 }
   0x6   : > { %p89_p1 = scmp.eq.s32.totalorder %s88_s20, 0  ;;  %p102_p2 = scmp.eq.s32.totalorder %s526_s16, 1 }
   0x7   : > { %p107_p3 = scmp.ne.s32.totalorder %s471_s13, %s467_s12  ;;  %p108_p4 = scmp.eq.s32.totalorder %s341_s17, 1 }
   0x8   : > { %s541_s21 = scalar_select %p89_p1, %s475_s14, %s91_s19  }
   0x9   : > { %p543_p5 = por %p102_p2, %p101_p0  ;;  %p547_p6 = por %p108_p4, %p107_p3 }
   0xa   : > { %p344_p7 = scmp.ge.s32.totalorder %s479_s15, 1  ;;  %p140_p8 = scmp.lt.s32.totalorder %s479_s15, 3 }
   0xc   : > { %p141_p9 = pnand %p344_p7, %p140_p8 }
   0xd   : > { %v171_v0 = vld [vmem:[%s621_s1] sm:$0xff] (!%p141_p9)  ;;  %v172_v1 = vld [vmem:[%s621_s1 + $0x8] sm:$0xf] (!%p141_p9)  ;;  %vm180_vm0 = vcmask (!%p141_p9), 1043456   ;;  %p164_p10 = scmp.lt.s32.totalorder (!%p141_p9), %s526_s16, 1  ;;  %vm481_vm1 = vmmov (!%p141_p9), 1  }
   0xe   : > { %144 = sbr.rel (%p141_p9) target bundleno = 257 (0x101), region = 32  ;;  %v369_v2 = vpack.c.bf16 (!%p141_p9), %v172_v1, %v171_v0  ;;  %vm370_vm2 = vmpackc.low (!%p141_p9), %vm180_vm0, %vm481_vm1  ;;  %vm173_vm3 = vcmask (!%p141_p9), 97280   ;;  %s161_s6 = sand.u32 (!%p141_p9), 1, %s471_s13   ;;  %v260_v5 = vld [vmem:[%s622_s2 + $0x8] sm:$0xff] (!%p141_p9)  ;;  %v259_v6 = vld [vmem:[%s622_s2] sm:$0xff] (!%p141_p9) }
   0xf   : > { %s345_s7 = sshll.u32 (!%p141_p9), %s161_s6, 4  ;;  %s357_s17 = sshll.u32 (!%p141_p9), %s526_s16, 8 }
  0x10   : > { %371 = vmatprep.subr.msk.bf16.mxu0 (!%p141_p9), %vm370_vm2, %v369_v2  ;;  %s163_s10 = scalar_lea.vmem (!%p141_p9), [#allocation2], %s345_s7  ;;  %s577_s26 = scalar_lea.hbm (!%p141_p9), %s623_s3, %s357_s17 }
  0x11   : > { %374 = vmatpush3.bf16.msk.msra.mxu0 (!%p141_p9), %vm370_vm2, %v369_v2  ;;  %s279_s11 = sshll.u32 (!%p141_p9), %s163_s10, 4  ;;  %s572_s11 = int_to_ptr.vmem [resolvable:$true] %s279_s11 }
  0x12   : > { %s417_s27 = scalar_lea.vmem (!%p141_p9), %s572_s11, 256 }
  0x13   : > { %p418_p11 = scmp.ne.s32.totalorder (!%p141_p9), %s572_s11, %s417_s27 }
  0x15   : > { %s165_s28 = scalar_select %p164_p10, %s526_s16, 1 }
  0x16   : > { %s579_s16 = scalar_lea.sflag [#allocation3], %s161_s6  ;;  %p419_p12 = pnand %p418_p11, %p543_p5 }
  0x17   : > { %s356_s29 = sshll.u32 %s165_s28, 4  ;;  %s482_s28 = smov [#allocation2]  }
  0x18   : > { %s168_s5 = scalar_lea.vmem %s620_s0, %s356_s29  ;;  %p420_p13 = pneg %p419_p12 }
  0x19   : > { %v169_v3 = vld [vmem:[%s168_s5] sm:$0xff]  ;;  %v170_v4 = vld [vmem:[%s168_s5 + $0x8] sm:$0xff]  ;;  %s421_s29 = sshll.u32 %s482_s28, 4  ;;  %s422_s29 = int_to_ptr.vmem [resolvable:$false] %s421_s29 }
  0x1a   : > { %366 = vmatprep.mubr.msk.f32.mxu0 %vm173_vm3, %v169_v3  ;;  %s423_s30 = scalar_lea.vmem %s422_s29, 512  ;;  %p424_p0 = scmp.lt.s32.totalorder %s572_s11, %s422_s29 }
  0x1b   : > { %367 = vmatmul.mubr.msk.f32.vlgmr.msra.gmra.mrb[0].mxu0 %vm173_vm3, %v170_v4  ;;  %p425_p1 = scmp.lt.s32.totalorder %s423_s30, %s417_s27 }
  0x1d   : > { %p426_p2 = por %p425_p1, %p424_p0 }
  0x1f   : > { %p427_p3 = pnand %p426_p2, %p420_p13 }
  0xee   : > { %v368_v7 = vpop.f32.mrb[0].mxu0 }
  0xef   : > { %v262_v8 = vadd.f32 %v368_v7, %v260_v5  ;;  %v250_v9 = vpop.f32.mrb[1].mxu0 }
  0xf0   : > { %v261_v10 = vadd.f32 %v259_v6, %v250_v9 }
  0xf1   : > { %264 = vst [vmem:[%s163_s10 + $0x8] sm:$0xff] %v262_v8 }
  0xf2   : > { %263 = vst [vmem:[%s163_s10] sm:$0xff] %v261_v10 }
  0xf3   : > { %430 = shalt.err (!%p427_p3)
}
  0xf4   : > { %s431_s4 = scalar_lea.hbm %s577_s26, 256  ;;  %s435_s7 = scalar_lea.hbm %s623_s3, 512 }
  0xf5   : > { %p432_p4 = scmp.ne.s32.totalorder %s577_s26, %s431_s4  ;;  %p436_p9 = scmp.lt.u32.totalorder %s577_s26, %s623_s3 }
  0xf6   : > { %p437_p10 = scmp.lt.u32.totalorder %s435_s7, %s431_s4  ;;  %p439_p12 = scmp.lt.u32.totalorder %s431_s4, %s577_s26 }
  0xf7   : > { %p433_p7 = pnand %p432_p4, %p543_p5 }
  0xf8   : > { %p438_p11 = por %p437_p10, %p436_p9 }
  0xf9   : > { %p434_p8 = pneg %p433_p7 }
  0xfa   : > { %p440_p13 = por %p439_p12, %p438_p11 }
  0xfc   : > { %p441_p0 = pnand %p440_p13, %p434_p8 }
  0xfe   : > { %444 = shalt.err (!%p441_p0)
}
  0xff   : > { %s483_s10 = smov 128   ;;  %s484_s17 = smov 8  }
 0x100   : > { %375 = dma.vmem_to_hbm [thread:$0]  (%p543_p5), %s572_s11, 256, %s577_s26, %s579_s16, %s483_s10, %s483_s10, %s484_s17  }
 0x101 PF: > { %p381_p1 = scmp.ge.s32.totalorder %s479_s15, 2  ;;  %s294_s19 = sand.u32 1, %s467_s12  }
 0x102   : > { %s295_s20 = scalar_lea.sflag [#allocation3], %s294_s19 }
 0x103   : > { %p378_p2 = pnand %p381_p1, %p547_p6 }
 0x105   : > { %462 = dma.done.wait (!%p378_p2), %s295_s20, 256  }
 0x106   : > { %464 = vsyncadd (!%p378_p2), %s295_s20, 4294967040  ;;  %p13_p3 = scmp.ge.s32.totalorder %s530_s18, 4   ;;  %s626_s12 = smov %s471_s13 }
 0x107   : > { %s627_s13 = smov %s475_s14  ;;  %s628_s14 = smov %s541_s21 }
 0x108   : > { %s629_s15 = smov %s530_s18  ;;  %15 = sbr.rel (!%p13_p3) target bundleno = 3 (0x3), region = 67 }
 0x10f   :  { %300 = vsyncpa [#allocation3], 1 }
 0x110   :  { %302 = vsyncpa [#allocation3 + $0x1], 1 }

</bundles_post_ra>
